<compile_context>
chip_gen: v6e
topology: v6e:2x2x1
jax: 0.10.0
libtpu: 0.0.40
codegen_flags: <defaults>
</compile_context>

<pallas_src>
import functools

import jax
import jax.numpy as jnp
from jax.experimental import pallas as pl
from jax.experimental.pallas import tpu as pltpu


def _cross_attn_kernel(x_ref, c_ref, wq_ref, wk_ref, wv_ref, wo_ref, bo_ref,
                       o_ref, k_scr, v_scr, *, heads, dim_head):
    """One (batch, query-tile) grid step with all heads fused.

    x_ref : (1, TN, Dq)     query tokens for this (batch, query-tile)
    c_ref : (1, M, Dc)      full context for this batch element
    wq_ref: (Dq, H*dh)      to_q weight (pre-transposed; 1/sqrt(dh) folded in)
    wk_ref: (Dc, H*dh)      to_k weight
    wv_ref: (Dc, H*dh)      to_v weight
    wo_ref: (H*dh, Dq)      to_out[0] weight (pre-transposed)
    bo_ref: (1, Dq)         to_out[0] bias (float32)
    o_ref : (1, TN, Dq)     output tile (written exactly once)
    k_scr : (H, M, dh) cdt  K for this batch element (persists across t steps)
    v_scr : (H, M, dh) cdt  V for this batch element
    """
    H, dh = heads, dim_head
    cdt = x_ref.dtype                     # MXU input dtype (f32 or bf16)

    # ---- K/V hoist: compute once per batch element (first query tile). ----
    # The query-tile grid axis is "arbitrary", so this scratch legally
    # persists and is reused for every subsequent query tile of this batch.
    @pl.when(pl.program_id(1) == 0)
    def _():
        c = c_ref[0]                                                   # (M, Dc)
        M = c.shape[0]
        k = jnp.dot(c, wk_ref[...],
                    preferred_element_type=jnp.float32).astype(cdt)   # (M, H*dh)
        v = jnp.dot(c, wv_ref[...],
                    preferred_element_type=jnp.float32).astype(cdt)   # (M, H*dh)
        # Head-major (H, M, dh) layout so the attention matmuls are
        # head-batched (no per-head lane slicing, no concatenate).
        k_scr[...] = jnp.transpose(k.reshape(M, H, dh), (1, 0, 2))
        v_scr[...] = jnp.transpose(v.reshape(M, H, dh), (1, 0, 2))

    # ---- Q projection for this tile: one big MXU matmul, then cast. ----
    x = x_ref[0]                                                       # (TN, Dq)
    TN = x.shape[0]
    q = jnp.dot(x, wq_ref[...],
                preferred_element_type=jnp.float32).astype(cdt)       # (TN, H*dh)
    q3 = jnp.transpose(q.reshape(TN, H, dh), (1, 0, 2))               # (H, TN, dh)

    # ---- QK^T, head-batched, cdt x cdt -> f32 accumulation. ----
    sim = jnp.einsum('hnd,hmd->hnm', q3, k_scr[...],
                     preferred_element_type=jnp.float32)              # (H, TN, M)

    # TODO(synk): optional `mask` argument (masked_fill with -finfo.max before
    # softmax) is not wired through; the reference forward uses mask=None.

    # Softmax kept entirely in f32 (v5e VPU/EUP have no bf16 path).
    sim = sim - jnp.max(sim, axis=-1, keepdims=True)
    p = jnp.exp(sim)                                                   # (H, TN, M)
    inv_l = pl.reciprocal(jnp.sum(p, axis=-1, keepdims=True),
                          approx=True)                                 # (H, TN, 1)

    # ---- P.V, head-batched; normalize AFTER the matmul (a (TN, dh) VPU
    # multiply per head instead of (TN, M)). ----
    out3 = jnp.einsum('hnm,hmd->hnd', p.astype(cdt), v_scr[...],
                      preferred_element_type=jnp.float32)             # (H, TN, dh)
    out3 = (out3 * inv_l).astype(cdt)

    # ---- Merge heads, single output projection (contraction K = H*dh). ----
    out_all = jnp.transpose(out3, (1, 0, 2)).reshape(TN, H * dh)      # (TN, H*dh)
    proj = jnp.dot(out_all, wo_ref[...],
                   preferred_element_type=jnp.float32)                # (TN, Dq)
    o_ref[0] = (proj + bo_ref[...]).astype(o_ref.dtype)


def _vmem_bytes_estimate(block_n, *, M, Dq, Dc, heads, dim_head, cdt_bytes):
    """Rough VMEM footprint (bytes) of one grid step, with a safety factor."""
    f32 = 4
    hd = heads * dim_head
    weights = (Dq * hd + 2 * Dc * hd + hd * Dq) * cdt_bytes + Dq * f32  # single-buffered
    ctx = 2 * M * Dc * cdt_bytes                                        # double-buffered
    kv = 2 * heads * M * dim_head * cdt_bytes                           # K/V scratch
    io = 2 * block_n * Dq * (cdt_bytes + f32)                           # x / out, double-buffered
    inter = block_n * hd * (2 * f32 + 2 * cdt_bytes)                    # q / merged-out
    inter += 2 * heads * block_n * M * f32                              # sim + p (all heads)
    inter += heads * block_n * dim_head * f32                           # out3
    inter += block_n * Dq * f32                                         # proj
    return int(1.25 * (weights + ctx + kv + io + inter))


def _auto_block_n(N, budget_bytes, **dims):
    """Largest query tile (divisor of N, multiple of 8) that fits the budget."""
    if N <= 8:
        return N
    cands = sorted({N} | {d for d in range(8, N, 8) if N % d == 0}, reverse=True)
    for bn in cands:
        if _vmem_bytes_estimate(bn, **dims) <= budget_bytes:
            return bn
    return cands[-1]


_HAS_BUFFERED = hasattr(pl, "Buffered")


def _const_spec(shape):
    """Grid-invariant block: DMA'd once, single-buffered when supported."""
    idx = lambda b, t: (0,) * len(shape)
    if _HAS_BUFFERED:
        try:
            return pl.BlockSpec(shape, idx, pipeline_mode=pl.Buffered(1))
        except TypeError:  # older BlockSpec without pipeline_mode
            pass
    return pl.BlockSpec(shape, idx)


def cross_attention(x, context, wq, wk, wv, wo, bo, *, heads, dim_head,
                    block_n=None, compute_dtype=None,
                    vmem_budget_bytes=48 * 1024 * 1024):
    """Pallas CrossAttention forward (mask=None, dropout inactive).

    x:       (B, N, Dq)  float32
    context: (B, M, Dc)  float32, or None for self-attention
    wq:      (Dq, H*dh)  (= PyTorch to_q.weight.T)
    wk, wv:  (Dc, H*dh)
    wo:      (H*dh, Dq)  (= PyTorch to_out[0].weight.T)
    bo:      (Dq,)
    block_n: optional query-token tile; default derived from the VMEM budget.
    compute_dtype: dtype fed to the MXU (jnp.bfloat16 recommended on all TPU
             generations); accumulation and output stay float32.
    returns  (B, N, Dq)
    """
    if context is None:
        context = x
    B, N, Dq = x.shape
    _, M, Dc = context.shape
    HD = heads * dim_head
    assert wq.shape == (Dq, HD) and wk.shape == (Dc, HD)
    assert wv.shape == (Dc, HD) and wo.shape == (HD, Dq) and bo.shape == (Dq,)

    # Fold 1/sqrt(dh) into the query projection weight (removes a per-step
    # (TN, M)-sized VPU multiply from the kernel).
    wq = wq * jnp.asarray(dim_head ** (-0.5), wq.dtype)

    cdt = jnp.dtype(compute_dtype) if compute_dtype is not None else x.dtype
    x_c = x.astype(cdt)
    c_c = context.astype(cdt)
    wq_c, wk_c, wv_c, wo_c = (w.astype(cdt) for w in (wq, wk, wv, wo))
    bo_2d = bo.reshape(1, Dq).astype(jnp.float32)

    dims = dict(M=M, Dq=Dq, Dc=Dc, heads=heads, dim_head=dim_head,
                cdt_bytes=cdt.itemsize)
    if block_n is None:
        block_n = _auto_block_n(N, vmem_budget_bytes, **dims)
    if block_n >= N:
        block_n = N
    else:
        assert N % block_n == 0 and block_n % 8 == 0, "invalid query tile size"
    n_tiles = N // block_n
    # TODO(synk): pad Dq to a multiple of 128 for real model widths so the
    # output store is lane-dense (unmasked vst); left unpadded for the demo.

    kernel = functools.partial(_cross_attn_kernel,
                               heads=heads, dim_head=dim_head)

    grid_spec = pltpu.PrefetchScalarGridSpec(
        num_scalar_prefetch=0,
        grid=(B, n_tiles),
        in_specs=[
            pl.BlockSpec((1, block_n, Dq), lambda b, t: (b, t, 0)),   # x tile
            pl.BlockSpec((1, M, Dc),       lambda b, t: (b, 0, 0)),   # context
            _const_spec((Dq, HD)),                                    # wq
            _const_spec((Dc, HD)),                                    # wk
            _const_spec((Dc, HD)),                                    # wv
            _const_spec((HD, Dq)),                                    # wo
            _const_spec((1, Dq)),                                     # bias
        ],
        out_specs=pl.BlockSpec((1, block_n, Dq), lambda b, t: (b, t, 0)),
        scratch_shapes=[
            pltpu.VMEM((heads, M, dim_head), cdt),   # K, head-major
            pltpu.VMEM((heads, M, dim_head), cdt),   # V, head-major
        ],
    )

    return pl.pallas_call(
        kernel,
        out_shape=jax.ShapeDtypeStruct((B, N, Dq), x.dtype),
        grid_spec=grid_spec,
        compiler_params=pltpu.CompilerParams(
            # Batch axis "parallel" (megacore).  The query-tile axis MUST be
            # "arbitrary": the K/V scratch persists across its steps.
            # TODO(synk): for B < 2 on v7x, split t into (parallel, arbitrary)
            # sub-axes (accepting K/V recompute per outer step) to use both TCs.
            dimension_semantics=("parallel", "arbitrary"),
            vmem_limit_bytes=int(vmem_budget_bytes)),
    )(x_c, c_c, wq_c, wk_c, wv_c, wo_c, bo_2d)


def cross_attention_ref(x, context, wq, wk, wv, wo, bo, *, heads, dim_head):
    """Pure-JAX reference mirroring the PyTorch forward (mask=None, dropout=0)."""
    B, N, Dq = x.shape
    H, dh = heads, dim_head
    q = x @ wq
    k = context @ wk
    v = context @ wv

    def split(t):
        b, n, _ = t.shape
        return t.reshape(b, n, H, dh).transpose(0, 2, 1, 3).reshape(b * H, n, dh)

    q, k, v = split(q), split(k), split(v)
    sim = jnp.einsum('bid,bjd->bij', q, k) * (dim_head ** -0.5)
    attn = jax.nn.softmax(sim, axis=-1)
    out = jnp.einsum('bij,bjd->bid', attn, v)
    out = out.reshape(B, H, N, dh).transpose(0, 2, 1, 3).reshape(B, N, H * dh)
    return out @ wo + bo


if __name__ == "__main__":
    # Small, deterministic config.
    B = 2            # batch
    N = 16           # query tokens
    M = 8            # context tokens
    query_dim = 32
    context_dim = 48
    heads = 4
    dim_head = 16
    inner_dim = heads * dim_head

    key = jax.random.PRNGKey(0)
    kx, kc, k1, k2, k3, k4, k5 = jax.random.split(key, 7)

    x = jax.random.normal(kx, (B, N, query_dim), dtype=jnp.float32)
    context = jax.random.normal(kc, (B, M, context_dim), dtype=jnp.float32)

    # Synthetic weights (nn.Linear weights stored pre-transposed as (in, out)).
    wq = jax.random.normal(k1, (query_dim, inner_dim), jnp.float32) * 0.05
    wk = jax.random.normal(k2, (context_dim, inner_dim), jnp.float32) * 0.05
    wv = jax.random.normal(k3, (context_dim, inner_dim), jnp.float32) * 0.05
    wo = jax.random.normal(k4, (inner_dim, query_dim), jnp.float32) * 0.05
    bo = jax.random.normal(k5, (query_dim,), jnp.float32) * 0.05

    ref = cross_attention_ref(x, context, wq, wk, wv, wo, bo,
                              heads=heads, dim_head=dim_head)

    # f32 compute path, auto block_n (whole N per step here).
    out = cross_attention(x, context, wq, wk, wv, wo, bo,
                          heads=heads, dim_head=dim_head)
    out = jax.block_until_ready(out)
    assert out.shape == (B, N, query_dim)
    # approx=True softmax reciprocal -> slightly relaxed tolerance vs exact ref.
    assert jnp.allclose(out, ref, atol=2e-3, rtol=2e-3), "f32 mismatch vs ref"

    # Multi-tile query path: exercises the hoisted K/V scratch reuse across
    # query tiles of the same batch element.
    out_tiled = cross_attention(x, context, wq, wk, wv, wo, bo,
                                heads=heads, dim_head=dim_head, block_n=8)
    out_tiled = jax.block_until_ready(out_tiled)
    assert jnp.allclose(out_tiled, ref, atol=2e-3, rtol=2e-3), "tiled mismatch"

    # bf16 MXU path: bf16 QK^T / P.V inputs, f32 accumulation, f32 output.
    out_bf16 = cross_attention(x, context, wq, wk, wv, wo, bo,
                               heads=heads, dim_head=dim_head,
                               compute_dtype=jnp.bfloat16)
    out_bf16 = jax.block_until_ready(out_bf16)
    assert jnp.allclose(out_bf16, ref, atol=5e-2, rtol=5e-2), "bf16 mismatch"

    print("KERNEL_OK")
</pallas_src>

<mosaic_0001>
module attributes {stable_mosaic.version = 11 : i64} {
  func.func @_cross_attn_kernel(%arg0: i32, %arg1: i32, %arg2: memref<1x16x32xf32, #tpu.memory_space<vmem>>, %arg3: memref<1x8x48xf32, #tpu.memory_space<vmem>>, %arg4: memref<32x64xf32, #tpu.memory_space<vmem>>, %arg5: memref<48x64xf32, #tpu.memory_space<vmem>>, %arg6: memref<48x64xf32, #tpu.memory_space<vmem>>, %arg7: memref<64x32xf32, #tpu.memory_space<vmem>>, %arg8: memref<1x32xf32, #tpu.memory_space<vmem>>, %arg9: memref<1x16x32xf32, #tpu.memory_space<vmem>>, %arg10: memref<4x8x16xf32, #tpu.memory_space<vmem>>, %arg11: memref<4x8x16xf32, #tpu.memory_space<vmem>>) attributes {dimension_semantics = [#tpu.dimension_semantics<parallel>, #tpu.dimension_semantics<arbitrary>], iteration_bounds = array<i64: 2, 1>, scalar_prefetch = 0 : i64, scratch_operands = 2 : i64, tpu.core_type = #tpu.core_type<tc>, window_params = [{transform_indices = @transform_0, window_bounds = array<i64: 1, 16, 32>}, {transform_indices = @transform_1, window_bounds = array<i64: 1, 8, 48>}, {pipeline_mode = #tpu.pipeline_mode<synchronous>, transform_indices = @transform_2, window_bounds = array<i64: 32, 64>}, {pipeline_mode = #tpu.pipeline_mode<synchronous>, transform_indices = @transform_3, window_bounds = array<i64: 48, 64>}, {pipeline_mode = #tpu.pipeline_mode<synchronous>, transform_indices = @transform_4, window_bounds = array<i64: 48, 64>}, {pipeline_mode = #tpu.pipeline_mode<synchronous>, transform_indices = @transform_5, window_bounds = array<i64: 64, 32>}, {pipeline_mode = #tpu.pipeline_mode<synchronous>, transform_indices = @transform_6, window_bounds = array<i64: 1, 32>}, {transform_indices = @transform_7, window_bounds = array<i64: 1, 16, 32>}]} {
    %c0_i32 = arith.constant 0 : i32
    %0 = arith.cmpi eq, %arg1, %c0_i32 : i32
    %1 = arith.extui %0 : i1 to i32
    %c0_i32_0 = arith.constant 0 : i32
    %2 = arith.cmpi ne, %1, %c0_i32_0 : i32
    scf.if %2 {
      %c0_23 = arith.constant 0 : index
      %c0_24 = arith.constant 0 : index
      %c0_25 = arith.constant 0 : index
      %33 = vector.load %arg3[%c0_23, %c0_24, %c0_25] : memref<1x8x48xf32, #tpu.memory_space<vmem>>, vector<1x8x48xf32>
      %34 = vector.shape_cast %33 : vector<1x8x48xf32> to vector<8x48xf32>
      %c0_26 = arith.constant 0 : index
      %c0_27 = arith.constant 0 : index
      %35 = vector.load %arg5[%c0_26, %c0_27] : memref<48x64xf32, #tpu.memory_space<vmem>>, vector<48x64xf32>
      %cst_28 = arith.constant dense<0.000000e+00> : vector<8x64xf32>
      %36 = tpu.matmul %34, %35, %cst_28 {dimension_numbers = #tpu.dot_dimension_numbers<[1], [0], [0], [1], [0, 0, 1, 1], [], []>} : vector<8x48xf32>, vector<48x64xf32>, vector<8x64xf32> -> vector<8x64xf32>
      %c0_29 = arith.constant 0 : index
      %c0_30 = arith.constant 0 : index
      %37 = vector.load %arg6[%c0_29, %c0_30] : memref<48x64xf32, #tpu.memory_space<vmem>>, vector<48x64xf32>
      %cst_31 = arith.constant dense<0.000000e+00> : vector<8x64xf32>
      %38 = tpu.matmul %34, %37, %cst_31 {dimension_numbers = #tpu.dot_dimension_numbers<[1], [0], [0], [1], [0, 0, 1, 1], [], []>} : vector<8x48xf32>, vector<48x64xf32>, vector<8x64xf32> -> vector<8x64xf32>
      %39 = vector.shape_cast %36 : vector<8x64xf32> to vector<8x4x16xf32>
      %40 = tpu.transpose %39, [1, 0, 2] : vector<8x4x16xf32> -> vector<4x8x16xf32>
      %c0_32 = arith.constant 0 : index
      %c0_33 = arith.constant 0 : index
      %c0_34 = arith.constant 0 : index
      %41 = vector.load %arg10[%c0_32, %c0_33, %c0_34] : memref<4x8x16xf32, #tpu.memory_space<vmem>>, vector<4x8x16xf32>
      tpu.vector_store %arg10[%c0_32, %c0_33, %c0_34], %40 {strides = array<i32>} : memref<4x8x16xf32, #tpu.memory_space<vmem>>, vector<4x8x16xf32>,
      %42 = vector.shape_cast %38 : vector<8x64xf32> to vector<8x4x16xf32>
      %43 = tpu.transpose %42, [1, 0, 2] : vector<8x4x16xf32> -> vector<4x8x16xf32>
      %c0_35 = arith.constant 0 : index
      %c0_36 = arith.constant 0 : index
      %c0_37 = arith.constant 0 : index
      %44 = vector.load %arg11[%c0_35, %c0_36, %c0_37] : memref<4x8x16xf32, #tpu.memory_space<vmem>>, vector<4x8x16xf32>
      tpu.vector_store %arg11[%c0_35, %c0_36, %c0_37], %43 {strides = array<i32>} : memref<4x8x16xf32, #tpu.memory_space<vmem>>, vector<4x8x16xf32>,
    } else {
    }
    %c0 = arith.constant 0 : index
    %c0_1 = arith.constant 0 : index
    %c0_2 = arith.constant 0 : index
    %3 = vector.load %arg2[%c0, %c0_1, %c0_2] : memref<1x16x32xf32, #tpu.memory_space<vmem>>, vector<1x16x32xf32>
    %4 = vector.shape_cast %3 : vector<1x16x32xf32> to vector<16x32xf32>
    %c0_3 = arith.constant 0 : index
    %c0_4 = arith.constant 0 : index
    %5 = vector.load %arg4[%c0_3, %c0_4] : memref<32x64xf32, #tpu.memory_space<vmem>>, vector<32x64xf32>
    %cst = arith.constant dense<0.000000e+00> : vector<16x64xf32>
    %6 = tpu.matmul %4, %5, %cst {dimension_numbers = #tpu.dot_dimension_numbers<[1], [0], [0], [1], [0, 0, 1, 1], [], []>} : vector<16x32xf32>, vector<32x64xf32>, vector<16x64xf32> -> vector<16x64xf32>
    %7 = vector.shape_cast %6 : vector<16x64xf32> to vector<16x4x16xf32>
    %8 = tpu.transpose %7, [1, 0, 2] : vector<16x4x16xf32> -> vector<4x16x16xf32>
    %c0_5 = arith.constant 0 : index
    %c0_6 = arith.constant 0 : index
    %c0_7 = arith.constant 0 : index
    %9 = vector.load %arg10[%c0_5, %c0_6, %c0_7] : memref<4x8x16xf32, #tpu.memory_space<vmem>>, vector<4x8x16xf32>
    "tpu.trace_start"() <{level = 10 : i32, message = "hnd,hmd->hnm"}> : () -> ()
    %cst_8 = arith.constant dense<0.000000e+00> : vector<4x16x8xf32>
    %10 = tpu.matmul %8, %9, %cst_8 {dimension_numbers = #tpu.dot_dimension_numbers<[2], [2], [1], [1], [0, 0, 0, 1, 1, 1], [0], [0]>} : vector<4x16x16xf32>, vector<4x8x16xf32>, vector<4x16x8xf32> -> vector<4x16x8xf32>
    "tpu.trace_stop"() : () -> ()
    %cst_9 = arith.constant dense<0xFF800000> : vector<4x16xf32>
    %11 = vector.multi_reduction <maximumf>, %10, %cst_9 [2] : vector<4x16x8xf32> to vector<4x16xf32>
    %12 = vector.shape_cast %11 : vector<4x16xf32> to vector<4x16x1xf32>
    %13 = vector.broadcast %12 : vector<4x16x1xf32> to vector<4x16x8xf32>
    %14 = arith.subf %10, %13 : vector<4x16x8xf32>
    %15 = math.exp %14 : vector<4x16x8xf32>
    %cst_10 = arith.constant dense<0.000000e+00> : vector<4x16xf32>
    %16 = vector.multi_reduction <add>, %15, %cst_10 [2] : vector<4x16x8xf32> to vector<4x16xf32>
    %17 = vector.shape_cast %16 : vector<4x16xf32> to vector<4x16x1xf32>
    %18 = tpu.reciprocal %17 {approx = true} : vector<4x16x1xf32> -> vector<4x16x1xf32>
    %c0_11 = arith.constant 0 : index
    %c0_12 = arith.constant 0 : index
    %c0_13 = arith.constant 0 : index
    %19 = vector.load %arg11[%c0_11, %c0_12, %c0_13] : memref<4x8x16xf32, #tpu.memory_space<vmem>>, vector<4x8x16xf32>
    "tpu.trace_start"() <{level = 10 : i32, message = "hnm,hmd->hnd"}> : () -> ()
    %cst_14 = arith.constant dense<0.000000e+00> : vector<4x16x16xf32>
    %20 = tpu.matmul %15, %19, %cst_14 {dimension_numbers = #tpu.dot_dimension_numbers<[2], [1], [1], [2], [0, 0, 0, 1, 1, 2], [0], [0]>} : vector<4x16x8xf32>, vector<4x8x16xf32>, vector<4x16x16xf32> -> vector<4x16x16xf32>
    "tpu.trace_stop"() : () -> ()
    %21 = vector.broadcast %18 : vector<4x16x1xf32> to vector<4x16x16xf32>
    %22 = arith.mulf %20, %21 : vector<4x16x16xf32>
    %23 = tpu.transpose %22, [1, 0, 2] : vector<4x16x16xf32> -> vector<16x4x16xf32>
    %24 = vector.shape_cast %23 : vector<16x4x16xf32> to vector<16x64xf32>
    %c0_15 = arith.constant 0 : index
    %c0_16 = arith.constant 0 : index
    %25 = vector.load %arg7[%c0_15, %c0_16] : memref<64x32xf32, #tpu.memory_space<vmem>>, vector<64x32xf32>
    %cst_17 = arith.constant dense<0.000000e+00> : vector<16x32xf32>
    %26 = tpu.matmul %24, %25, %cst_17 {dimension_numbers = #tpu.dot_dimension_numbers<[1], [0], [0], [1], [0, 0, 1, 1], [], []>} : vector<16x64xf32>, vector<64x32xf32>, vector<16x32xf32> -> vector<16x32xf32>
    %c0_18 = arith.constant 0 : index
    %c0_19 = arith.constant 0 : index
    %27 = vector.load %arg8[%c0_18, %c0_19] : memref<1x32xf32, #tpu.memory_space<vmem>>, vector<1x32xf32>
    %28 = vector.broadcast %27 : vector<1x32xf32> to vector<16x32xf32>
    %29 = arith.addf %26, %28 : vector<16x32xf32>
    %c0_20 = arith.constant 0 : index
    %c0_21 = arith.constant 0 : index
    %c0_22 = arith.constant 0 : index
    %30 = vector.load %arg9[%c0_20, %c0_21, %c0_22] : memref<1x16x32xf32, #tpu.memory_space<vmem>>, vector<1x16x32xf32>
    %31 = vector.shape_cast %30 : vector<1x16x32xf32> to vector<16x32xf32>
    %32 = vector.shape_cast %29 : vector<16x32xf32> to vector<1x16x32xf32>
    tpu.vector_store %arg9[%c0_20, %c0_21, %c0_22], %32 {strides = array<i32>} : memref<1x16x32xf32, #tpu.memory_space<vmem>>, vector<1x16x32xf32>,
    return
  }
  func.func @transform_0(%arg0: i32, %arg1: i32) -> (i32, i32, i32) {
    %c0_i32 = arith.constant 0 : i32
    %c0_i32_0 = arith.constant 0 : i32
    return %arg0, %arg1, %c0_i32 : i32, i32, i32
  }
  func.func @transform_1(%arg0: i32, %arg1: i32) -> (i32, i32, i32) {
    %c0_i32 = arith.constant 0 : i32
    %c0_i32_0 = arith.constant 0 : i32
    %c0_i32_1 = arith.constant 0 : i32
    return %arg0, %c0_i32, %c0_i32_0 : i32, i32, i32
  }
  func.func @transform_2(%arg0: i32, %arg1: i32) -> (i32, i32) {
    %c0_i32 = arith.constant 0 : i32
    %c0_i32_0 = arith.constant 0 : i32
    %c0_i32_1 = arith.constant 0 : i32
    return %c0_i32, %c0_i32_0 : i32, i32
  }
  func.func @transform_3(%arg0: i32, %arg1: i32) -> (i32, i32) {
    %c0_i32 = arith.constant 0 : i32
    %c0_i32_0 = arith.constant 0 : i32
    %c0_i32_1 = arith.constant 0 : i32
    return %c0_i32, %c0_i32_0 : i32, i32
  }
  func.func @transform_4(%arg0: i32, %arg1: i32) -> (i32, i32) {
    %c0_i32 = arith.constant 0 : i32
    %c0_i32_0 = arith.constant 0 : i32
    %c0_i32_1 = arith.constant 0 : i32
    return %c0_i32, %c0_i32_0 : i32, i32
  }
  func.func @transform_5(%arg0: i32, %arg1: i32) -> (i32, i32) {
    %c0_i32 = arith.constant 0 : i32
    %c0_i32_0 = arith.constant 0 : i32
    %c0_i32_1 = arith.constant 0 : i32
    return %c0_i32, %c0_i32_0 : i32, i32
  }
  func.func @transform_6(%arg0: i32, %arg1: i32) -> (i32, i32) {
    %c0_i32 = arith.constant 0 : i32
    %c0_i32_0 = arith.constant 0 : i32
    %c0_i32_1 = arith.constant 0 : i32
    return %c0_i32, %c0_i32_0 : i32, i32
  }
  func.func @transform_7(%arg0: i32, %arg1: i32) -> (i32, i32, i32) {
    %c0_i32 = arith.constant 0 : i32
    %c0_i32_0 = arith.constant 0 : i32
    return %arg0, %arg1, %c0_i32 : i32, i32, i32
  }
}

</mosaic_0001>

<bundles_post_ra>
// kernel: tpu_custom_call.1
= control target key start
LH: loop header
LB: loop body
LE: loop exit
PB: predicated region body
PF: predicated region fallthrough
CT: control target
= control target key end

     0   :  { %s3549_s0 = inlined_call_operand.hbm [shape: f32[2,16,32], index: 0, kind: input, shape index: {}]   ;;  %s3550_s1 = inlined_call_operand.hbm [shape: f32[2,8,48], index: 1, kind: input, shape index: {}]   ;;  %s3551_s2 = inlined_call_operand.hbm [shape: f32[32,64], index: 2, kind: input, shape index: {}]   ;;  %s3552_s3 = inlined_call_operand.vmem [shape: f32[48,64], index: 3, kind: input, shape index: {}]   ;;  %s3553_s4 = inlined_call_operand.vmem [shape: f32[48,64], index: 4, kind: input, shape index: {}]   ;;  %s3554_s5 = inlined_call_operand.vmem [shape: f32[64,32], index: 5, kind: input, shape index: {}]   ;;  %s3555_s6 = inlined_call_operand.vmem [shape: f32[1,32], index: 6, kind: input, shape index: {}]   ;;  %s3556_s7 = inlined_call_operand.hbm [shape: f32[2,16,32], index: 7, kind: output, shape index: {}]  }
   0x1   :  { %3566 = sst [smem:[#allocation21_spill]] %s3549_s0 }
   0x2   :  { %3567 = sst [smem:[#allocation22_spill]] %s3551_s2 }
   0x3   :  { %3568 = sst [smem:[#allocation23_spill]] %s3556_s7 }
   0x4   :  { %12 = vsyncpa [#allocation5], 0 }
   0x5   :  { %14 = vsyncpa [#allocation5 + $0x1], 0 }
   0x6   :  { %15 = vsyncpa [#allocation8], 0 }
   0x7   :  { %17 = vsyncpa [#allocation8 + $0x1], 0 }
   0x8   :  { %18 = vsyncpa [#allocation6], 0 }
   0x9   :  { %20 = vsyncpa [#allocation6 + $0x1], 0  ;;  %s3074_s24 = smov 0   ;;  %s3076_s25 = smov 0  }
   0xa   :  { %s3078_s26 = smov 0   ;;  %s3080_s27 = smov 0  }
   0xb   :  { %s3082_s28 = smov 0   ;;  %s3084_s29 = smov 0  }
   0xc LB: > { %3569 = sst [smem:[#allocation15_spill]] %s2994_s24  ;;  %s3105_s30 = sadd.s32 4294967295, %s3014_s29   ;;  %s3014_s29 = sphi %s3084_s29, %s26_s29   ;;  %s3010_s28 = sphi %s3082_s28, %s3598_s28   ;;  %s3006_s27 = sphi %s3080_s27, %s3597_s27   ;;  %s3002_s26 = sphi %s3078_s26, %s3593_s26   ;;  %s2998_s25 = sphi %s3076_s25, %s3596_s25   ;;  %s2994_s24 = sphi %s3074_s24, %s3595_s24  }
   0xd   : > { %3570 = sst [smem:[#allocation16_spill]] %s3002_s26  ;;  %s2506_s8 = sadd.s32 4294967294, %s3014_s29  }
   0xe   : > { %3571 = sst [smem:[#allocation17_spill]] %s3014_s29  ;;  %p60_p0 = scmp.ne.s32.totalorder %s2998_s25, %s2994_s24 }
   0xf   : > { %p61_p1 = scmp.eq.s32.totalorder %s3105_s30, 0  ;;  %p223_p3 = scmp.eq.s32.totalorder %s2506_s8, 1 }
  0x10   : > { %p2507_p5 = scmp.ge.s32.totalorder %s3014_s29, 1  ;;  %p230_p7 = scmp.lt.s32.totalorder %s3014_s29, 3 }
  0x11   : > { %p3114_p4 = por %p61_p1, %p60_p0  ;;  %p3119_p6 = por %p223_p3, %p60_p0 }
  0x12   : > { %p3124_p8 = pnand %p2507_p5, %p230_p7  ;;  %s3016_s12 = smov [#allocation9]  }
  0x13   : > { %s3573_s10 = scalar_select %p3119_p6, 1, 0 }
  0x14   : > { %s242_s13 = sshll.u32 %s3016_s12, 4  ;;  %p2730_p9 = pneg %p3124_p8  ;;  %s243_s13 = int_to_ptr.vmem [resolvable:$true] %s242_s13 }
  0x15   : > { %3574 = sst [smem:[#allocation18_spill]] %s3573_s10  ;;  %p2509_p10 = scmp.ge.s32.totalorder %s3014_s29, 2 }
  0x16   : > { %p3133_p11 = pnand %p2730_p9, %p61_p1  ;;  %s38_s15 = sadd.s32 1, %s3010_s28 }
  0x17   : > { %s2855_s16 = scalar_lea.vmem %s243_s13, 512  ;;  %p2863_p5 = scmp.lt.s32.totalorder %s243_s13, %s243_s13 }
  0x18   : > { %p2846_p12 = pneg %p3133_p11  ;;  %p2856_p13 = scmp.ne.s32.totalorder %s243_s13, %s2855_s16 }
  0x19   : > { %p2864_p7 = scmp.lt.s32.totalorder %s2855_s16, %s2855_s16 }
  0x1a   : > { %p2858_p0 = pnand %p2856_p13, %p2846_p12 }
  0x1b   : > { %p2865_p2 = por %p2864_p7, %p2863_p5 }
  0x1c   : > { %p2859_p3 = pneg %p2858_p0 }
  0x1e   : > { %p2866_p6 = pnand %p2865_p2, %p2859_p3 }
  0x20   : > { %2869 = shalt.err (!%p2866_p6)
}
  0x21   : > { %s3557_s17 = smov 128   ;;  %s3558_s18 = smov 8  }
  0x22   : > { %s3577_s2 = sld [smem:[#allocation22_spill]]  ;;  %p40_p2 = scmp.ge.s32.totalorder %s38_s15, 2 }
  0x23   : > { %s47_s21 = sadd.s32 1, %s3002_s26  ;;  %p54_p6 = scmp.ne.s32.totalorder %s3002_s26, %s2998_s25 }
  0x24   : > { %p55_p9 = scmp.eq.s32.totalorder %s3014_s29, 0  ;;  %s3600_s15 = smov (%p40_p2, %s38_s15), 0 }
  0x25   : > { %3578 = sst [smem:[#allocation19_spill]] %s3600_s15  ;;  %p3580_p13 = scmp.eq.s32.totalorder %s3105_s30, 1 }
  0x26   : > { %p3154_p12 = por %p55_p9, %p54_p6  ;;  %s42_s8 = ssub.s32 %s3010_s28, %s3600_s15 }
  0x27   : > { %p3160_p0 = por %p3580_p13, %p54_p6  ;;  %p45_p3 = scmp.eq.s32.totalorder %s42_s8, 0 }
  0x28   : > { %2733 = dma.hbm_to_vmem [thread:$0]  (!%p3133_p11), %s3577_s2, 512, %s243_s13, [#allocation8], %s3557_s17, %s3557_s17, %s3558_s18  }
  0x29   : > { %p2746_p11 = scmp.lt.s32.totalorder %s3014_s29, 2  ;;  %s3168_s12 = sand.u32 1, %s3002_s26  }
  0x2a   : > { %s2510_s13 = sshll.u32 %s3168_s12, 4  ;;  %s2564_s16 = sshll.u32 %s3010_s28, 8 }
  0x2b   : > { %s3172_s14 = scalar_select %p45_p3, %s3002_s26, %s47_s21  }
  0x2c   : > { %s3583_s0 = sld [smem:[#allocation21_spill]]  ;;  %s272_s18 = scalar_lea.vmem [#allocation4], %s2510_s13 }
  0x2d   : > { %3582 = sst [smem:[#allocation20_spill]] %s3172_s14  ;;  %s281_s2 = sshll.u32 %s272_s18, 4  ;;  %s282_s2 = int_to_ptr.vmem [resolvable:$true] %s281_s2 }
  0x2e   : > { %p3180_p5 = pnand %p2746_p11, %p3154_p12  ;;  %s291_s8 = sand.u32 1, %s3014_s29  }
  0x2f   : > { %s2513_s10 = sshll.u32 %s3168_s12, 3  ;;  %s269_s24 = scalar_lea.sflag [#allocation5], %s3168_s12 }
  0x30   : > { %p2872_p7 = pneg %p3180_p5  ;;  %s2883_s21 = scalar_lea.vmem %s282_s2, 256 }
  0x31   : > { %p2884_p2 = scmp.ne.s32.totalorder %s282_s2, %s2883_s21  ;;  %s3019_s18 = smov [#allocation4]  }
  0x32   : > { %s280_s17 = scalar_lea.hbm %s3583_s0, %s2564_s16  ;;  %s2888_s13 = sshll.u32 %s3019_s18, 4  ;;  %s2889_s13 = int_to_ptr.vmem [resolvable:$false] %s2888_s13 }
  0x33   : > { %p2886_p6 = pnand %p2884_p2, %p2872_p7  ;;  %s2890_s22 = scalar_lea.vmem %s2889_s13, 512 }
  0x34   : > { %p2891_p12 = scmp.lt.s32.totalorder %s282_s2, %s2889_s13  ;;  %p2892_p13 = scmp.lt.s32.totalorder %s2890_s22, %s2883_s21 }
  0x35   : > { %p2887_p9 = pneg %p2886_p6 }
  0x36   : > { %p2893_p11 = por %p2892_p13, %p2891_p12 }
  0x38   : > { %p2894_p3 = pnand %p2893_p11, %p2887_p9 }
  0x3a   : > { %2897 = shalt.err (!%p2894_p3)
}
  0x3b   : > { %s3585_s12 = smov 8   ;;  %s3586_s16 = smov 128  }
  0x3c   : > { %2737 = dma.hbm_to_vmem [thread:$0]  (!%p3180_p5), %s280_s17, 256, %s282_s2, %s269_s24, %s3586_s16, %s3586_s16, %s3585_s12  }
  0x3d   : > { %s2514_s19 = sshll.u32 %s3010_s28, 7  ;;  %s295_s14 = scalar_lea.vmem [#allocation7], %s2513_s10 }
  0x3e   : > { %s300_s18 = scalar_lea.hbm %s3550_s1, %s2514_s19  ;;  %s302_s26 = sshll.u32 %s295_s14, 4  ;;  %s303_s26 = int_to_ptr.vmem [resolvable:$true] %s302_s26 }
  0x3f   : > { %s292_s21 = scalar_lea.sflag [#allocation8], %s291_s8  ;;  %s2911_s13 = scalar_lea.vmem %s303_s26, 128 }
  0x40   : > { %p2912_p2 = scmp.ne.s32.totalorder %s303_s26, %s2911_s13  ;;  %s3020_s22 = smov [#allocation7]  }
  0x41   : > { %s2916_s29 = sshll.u32 %s3020_s22, 4  ;;  %s2917_s29 = int_to_ptr.vmem [resolvable:$false] %s2916_s29 }
  0x42   : > { %p2914_p6 = pnand %p2912_p2, %p2872_p7  ;;  %s2918_s7 = scalar_lea.vmem %s2917_s29, 256 }
  0x43   : > { %p2919_p12 = scmp.lt.s32.totalorder %s303_s26, %s2917_s29  ;;  %p2920_p13 = scmp.lt.s32.totalorder %s2918_s7, %s2911_s13 }
  0x44   : > { %p2915_p9 = pneg %p2914_p6 }
  0x45   : > { %p2921_p11 = por %p2920_p13, %p2919_p12 }
  0x47   : > { %p2922_p3 = pnand %p2921_p11, %p2915_p9 }
  0x49   : > { %2925 = shalt.err (!%p2922_p3)
}
  0x4a   : > { %2740 = dma.hbm_to_vmem [thread:$0]  (!%p3180_p5), %s300_s18, 128, %s303_s26, %s292_s21  }
  0x4b   : > { %311 = sbr.rel (%p3124_p8) target bundleno = 1370 (0x55a), region = 48  ;;  %s3209_s0 = sand.u32 (!%p3124_p8), 1, %s2998_s25  }
  0x4c   : > { %s2516_s2 = sshll.u32 (!%p3124_p8), %s3209_s0, 4  ;;  %s314_s24 = scalar_lea.sflag (!%p3124_p8), [#allocation5], %s3209_s0 }
  0x4d   : > { %s3215_s7 = scalar_lea.vmem (!%p3124_p8), [#allocation4], %s2516_s2 }
  0x50   : > { %2977 = dma.done.wait (%p3114_p4), %s314_s24, 256  }
  0x51   : > { %2979 = vsyncadd (%p3114_p4), %s314_s24, 4294967040  ;;  %s322_s26 = sand.u32 1, %s3105_s30   ;;  %s2517_s29 = sshll.u32 %s3209_s0, 3 }
  0x52   : > { %s323_s10 = scalar_lea.sflag [#allocation8], %s322_s26  ;;  %s3223_s11 = scalar_lea.vmem [#allocation7], %s2517_s29 }
  0x53   : > { %2981 = dma.done.wait (%p3114_p4), %s323_s10, 128  }
  0x54   : > { %2983 = vsyncadd (%p3114_p4), %s323_s10, 4294967168 }
  0x55   : > { %2985 = dma.done.wait (%p61_p1), [#allocation8], 512  }
  0x56   : > { %2987 = vsyncadd (%p61_p1), [#allocation8], 4294966784  ;;  %v3021_v0 = vmov 0.0   ;;  %vm3022_vm0 = vmmov 0   ;;  %v378_v1 = vld [vmem:[%s3552_s3 + $0x28] sm:$0xff]  ;;  %v377_v3 = vld [vmem:[%s3552_s3 + $0x20] sm:$0xff]  ;;  %v544_v28 = vlaneseq }
  0x57   : > { %2620 = vmatprep.subr.mxu0 %v3021_v0  ;;  %2635 = vmatprep.subr.mxu1 %v3021_v0  ;;  %v458_v2 = vld [vmem:[%s3553_s4 + $0x28] sm:$0xff]  ;;  %v457_v4 = vld [vmem:[%s3553_s4 + $0x20] sm:$0xff]  ;;  %v376_v5 = vld [vmem:[%s3552_s3 + $0x18] sm:$0xff]  ;;  %vm379_vm1 = vcmask 392192   ;;  %vm836_vm2 = vcmask 261120   ;;  %s3024_s30 = smov 80  }
  0x58   : > { %2632 = vmatprep.mubr.msk.f32.mxu0 %vm3022_vm0, %v3021_v0  ;;  %2647 = vmatprep.mubr.msk.f32.mxu1 %vm3022_vm0, %v3021_v0  ;;  %v456_v6 = vld [vmem:[%s3553_s4 + $0x18] sm:$0xff]  ;;  %v375_v7 = vld [vmem:[%s3552_s3 + $0x10] sm:$0xff]  ;;  %v374_v9 = vld [vmem:[%s3552_s3 + $0x8] sm:$0xff]  ;;  %s3025_s16 = smov 96   ;;  %v3026_v26 = vmov 1983009808  }
  0x59   : > { %2621 = vmatpush3.msra.mxu0 %v378_v1  ;;  %2636 = vmatpush3.msra.mxu1 %v458_v2  ;;  %v455_v8 = vld [vmem:[%s3553_s4 + $0x10] sm:$0xff]  ;;  %v454_v10 = vld [vmem:[%s3553_s4 + $0x8] sm:$0xff]  ;;  %v373_v11 = vld [vmem:[%s3552_s3] sm:$0xff]  ;;  %v542_v27 = vunpack.c.l.s4 %v3026_v26  ;;  %v3027_v29 = vmov 1934713408   ;;  %v545_v32 = vshrl.u32 %v544_v28, 7 }
  0x5a   : > { %2622 = vmatprep.subr.mxu0 %v3021_v0  ;;  %2637 = vmatprep.subr.mxu1 %v3021_v0  ;;  %v453_v12 = vld [vmem:[%s3553_s4] sm:$0xff]  ;;  %v835_v14 = vld [vmem:[#allocation9 + $0x18] sm:$0xff]  ;;  %v833_v17 = vld [vmem:[#allocation9 + $0x8] sm:$0xff]  ;;  %v574_v30 = vunpack.c.l.s4 %v3027_v29  ;;  %vm675_vm3 = vcmask 130048   ;;  %vm1551_vm4 = vcmask 64512   ;;  %s3028_s12 = smov 32  }
  0x5b   : > { %2623 = vmatpush3.msra.mxu0 %v377_v3  ;;  %2638 = vmatpush3.msra.mxu1 %v457_v4  ;;  %v372_v13 = vld [vmem:[%s3223_s11] sm:$0xff]  ;;  %v832_v18 = vld [vmem:[#allocation9] sm:$0xff]  ;;  %v831_v19 = vld [vmem:[%s3215_s7 + $0x8] sm:$0xff]  ;;  %s3023_s11 = smov 112   ;;  %v543_v31 = vunpack.c.0.s8 %v542_v27  ;;  %vm2286_vm5 = vcmask 523264   ;;  %s365_s19 = scalar_lea.vmem [#allocation10], %s2516_s2 }
  0x5c   : > { %2624 = vmatprep.subr.mxu0 %v3021_v0  ;;  %2639 = vmatprep.subr.mxu1 %v3021_v0  ;;  %v830_v15 = vld [vmem:[%s3215_s7] sm:$0xff]  ;;  %v575_v35 = vunpack.c.0.s8 %v574_v30  ;;  %s2386_s20 = sshll.u32 %s365_s19, 4  ;;  %s2565_s18 = sshll.u32 %s3006_s27, 8  ;;  %s3494_s20 = int_to_ptr.vmem [resolvable:$true] %s2386_s20 }
  0x5d   : > { %2625 = vmatpush3.msra.mxu0 %v376_v5  ;;  %2640 = vmatpush3.msra.mxu1 %v456_v6  ;;  %v834_v16 = vld [vmem:[#allocation9 + $0x10] sm:$0xff]  ;;  %v3286_v36 = vsub.s32 %v543_v31, %v545_v32  ;;  %s3587_s22 = sld [smem:[#allocation23_spill]]  ;;  %s2371_s2 = scalar_lea.sflag [#allocation6], %s3209_s0 }
  0x5e   : > { %2626 = vmatprep.subr.mxu0 %v3021_v0  ;;  %2641 = vmatprep.subr.mxu1 %v3021_v0  ;;  %v3288_v42 = vsub.s32 %v575_v35, %v545_v32  ;;  %s2926_s27 = scalar_lea.vmem %s3494_s20, 256  ;;  %s3031_s26 = smov [#allocation10]  }
  0x5f   : > { %2627 = vmatpush3.msra.mxu0 %v375_v7  ;;  %2642 = vmatpush3.msra.mxu1 %v455_v8  ;;  %p2927_p1 = scmp.ne.s32.totalorder %s3494_s20, %s2926_s27  ;;  %s2930_s29 = sshll.u32 %s3031_s26, 4  ;;  %s2931_s29 = int_to_ptr.vmem [resolvable:$false] %s2930_s29 }
  0x60   : > { %2628 = vmatprep.subr.mxu0 %v3021_v0  ;;  %2643 = vmatprep.subr.mxu1 %v3021_v0  ;;  %s2932_s10 = scalar_lea.vmem %s2931_s29, 512  ;;  %p2933_p5 = scmp.lt.s32.totalorder %s3494_s20, %s2931_s29 }
  0x61   : > { %2629 = vmatpush3.msra.mxu0 %v374_v9  ;;  %2644 = vmatpush3.msra.mxu1 %v454_v10  ;;  %p2928_p4 = pnand %p2927_p1, %p3160_p0  ;;  %p2934_p7 = scmp.lt.s32.totalorder %s2932_s10, %s2926_s27 }
  0x62   : > { %2630 = vmatprep.subr.mxu0 %v3021_v0  ;;  %2645 = vmatprep.subr.mxu1 %v3021_v0 }
  0x63   : > { %2631 = vmatpush3.msra.mxu0 %v373_v11  ;;  %2646 = vmatpush3.msra.mxu1 %v453_v12  ;;  %s3499_s24 = scalar_lea.hbm %s3587_s22, %s2565_s18  ;;  %p2929_p8 = pneg %p2928_p4 }
  0x64   : > { %2633 = vmatmul.mubr.msk.f32.vlgmr.msra.gmra.mxu0 %vm379_vm1, %v372_v13  ;;  %2648 = vmatmul.mubr.msk.f32.vlgmr.msra.gmra.mxu1 %vm379_vm1, %v372_v13  ;;  %p2935_p2 = por %p2934_p7, %p2933_p5 }
  0x65   : > { %2650 = vmatprep.subr.mxu1 %v835_v14  ;;  %2658 = vmatprep.mubr.msk.f32.mxu1 %vm836_vm2, %v830_v15 }
  0x66   : > { %2651 = vmatpush3.msra.mxu1 %v835_v14  ;;  %p2936_p6 = pnand %p2935_p2, %p2929_p8 }
  0x67   : > { %2652 = vmatprep.subr.mxu1 %v834_v16 }
  0x68   : > { %2653 = vmatpush3.msra.mxu1 %v834_v16 }
  0x69   : > { %2654 = vmatprep.subr.mxu1 %v833_v17 }
  0x6a   : > { %2655 = vmatpush3.msra.mxu1 %v833_v17 }
  0x6b   : > { %2656 = vmatprep.subr.mxu1 %v832_v18 }
  0x6c   : > { %2657 = vmatpush3.msra.mxu1 %v832_v18 }
  0x6d   : > { %2659 = vmatmul.mubr.msk.f32.vlgmr.msra.gmra.mxu1 %vm836_vm2, %v831_v19 }
 0x124   : > { %v449_v20 = vpop.f32.mrf.mxu0  ;;  %v3276_v21 = vpop.f32.mrf.mxu1 }
 0x125   : > { %530 = vrot.lane.b32.xlu0 %v449_v20, %s3023_s11  ;;  %536 = vrot.lane.b32.xlu1 %v449_v20, %s3024_s30 }
 0x126   : > { %v2649_v22 = vpop.f32.mrf.mxu1  ;;  %v2634_v23 = vpop.f32.mrf.mxu0 }
 0x129   : > { %533 = vrot.lane.b32.xlu0 %v449_v20, %s3025_s16 }
 0x12d   : > { %v3278_v24 = vpop.f32.mrf.mxu1 }
 0x12e   : > { %922 = vrot.lane.b32.xlu0 %v3278_v24, %s3023_s11 }
 0x12f   : > { %v909_v25 = vpop.f32.mrf.mxu1 }
 0x130   : > { %920 = vrot.lane.b32.xlu1 %v909_v25, %s3023_s11 }
 0x132   : > { %926 = vrot.lane.b32.xlu0 %v909_v25, %s3025_s16 }
 0x134   : > { %932 = vrot.lane.b32.xlu1 %v909_v25, %s3024_s30 }
 0x136   : > { %934 = vrot.lane.b32.xlu0 %v3278_v24, %s3024_s30 }
 0x138   : > { %928 = vrot.lane.b32.xlu1 %v3278_v24, %s3025_s16 }
 0x13a   : > { %681 = vrot.lane.b32.xlu0 %v3276_v21, %s3023_s11  ;;  %s3029_s11 = smov 16  }
 0x13c   : > { %684 = vrot.lane.b32.xlu1 %v3276_v21, %s3025_s16 }
 0x140   : > { %687 = vrot.lane.b32.xlu1 %v3276_v21, %s3024_s30  ;;  %s3030_s30 = smov 48  }
 0x197   : > { %v531_v33 = vpop.permute.xlu0 %530  ;;  %v537_v34 = vpop.permute.xlu1 %536 }
 0x198   : > { %v555_v37 = vcombine.low %v531_v33, %v537_v34  ;;  %v556_v38 = vcombine.high %v531_v33, %v537_v34 }
 0x19a   : > { %v563_v43 = vrot.slane %v555_v37, %v3286_v36  ;;  %v570_v44 = vrot.slane %v556_v38, %v3286_v36 }
 0x19b   : > { %v534_v39 = vpop.permute.xlu0 %533 }
 0x19c   : > { %v539_v40 = vcombine.low %v449_v20, %v534_v39  ;;  %v540_v41 = vcombine.high %v449_v20, %v534_v39 }
 0x19e   : > { %v547_v45 = vrot.slane %v539_v40, %v3286_v36  ;;  %v554_v46 = vrot.slane %v540_v41, %v3286_v36 }
 0x1a0   : > { %v571_v47 = vcombine.low %v547_v45, %v563_v43  ;;  %v572_v48 = vcombine.high %v547_v45, %v563_v43  ;;  %v587_v49 = vcombine.low %v554_v46, %v570_v44  ;;  %v588_v50 = vcombine.high %v554_v46, %v570_v44  ;;  %v923_v51 = vpop.permute.xlu0 %922 }
 0x1a2   : > { %v579_v52 = vrot.slane %v571_v47, %v3288_v42  ;;  %v586_v53 = vrot.slane %v572_v48, %v3288_v42  ;;  %v595_v54 = vrot.slane %v587_v49, %v3288_v42  ;;  %v602_v55 = vrot.slane %v588_v50, %v3288_v42  ;;  %v921_v56 = vpop.permute.xlu1 %920 }
 0x1a4   : > { %v607_v57 = vcombine.low %v579_v52, %v586_v53  ;;  %v2522_v58 = vcombine.high %v579_v52, %v586_v53  ;;  %v623_v59 = vcombine.low %v595_v54, %v602_v55  ;;  %v2523_v60 = vcombine.high %v595_v54, %v602_v55  ;;  %v927_v61 = vpop.permute.xlu0 %926 }
 0x1a5   : > { %v938_v62 = vcombine.low %v909_v25, %v927_v61  ;;  %v939_v63 = vcombine.high %v909_v25, %v927_v61 }
 0x1a6   : > { %v614_v0 = vrot.slane %v607_v57, %v3286_v36  ;;  %v622_v1 = vrot.slane %v2522_v58, %v3286_v36  ;;  %v630_v2 = vrot.slane %v623_v59, %v3286_v36  ;;  %v638_v3 = vrot.slane %v2523_v60, %v3286_v36  ;;  %v933_v4 = vpop.permute.xlu1 %932 }
 0x1a7   : > { %v946_v5 = vrot.slane %v938_v62, %v3286_v36  ;;  %v953_v6 = vrot.slane %v939_v63, %v3286_v36  ;;  %v954_v7 = vcombine.low %v921_v56, %v933_v4  ;;  %v955_v8 = vcombine.high %v921_v56, %v933_v4 }
 0x1a8   : > { %v639_v9 = vcombine.low %v614_v0, %v622_v1  ;;  %v640_v10 = vcombine.high %v614_v0, %v622_v1  ;;  %v655_v11 = vcombine.low %v630_v2, %v638_v3  ;;  %v656_v12 = vcombine.high %v630_v2, %v638_v3  ;;  %v935_v13 = vpop.permute.xlu0 %934 }
 0x1a9   : > { %v962_v14 = vrot.slane %v954_v7, %v3286_v36  ;;  %v969_v15 = vrot.slane %v955_v8, %v3286_v36  ;;  %v1022_v16 = vcombine.low %v923_v51, %v935_v13  ;;  %v1023_v17 = vcombine.high %v923_v51, %v935_v13 }
 0x1aa   : > { %v647_v18 = vrot.slane %v639_v9, %v3288_v42  ;;  %v654_v19 = vrot.slane %v640_v10, %v3288_v42  ;;  %v663_v20 = vrot.slane %v655_v11, %v3288_v42  ;;  %v670_v22 = vrot.slane %v656_v12, %v3288_v42  ;;  %v929_v23 = vpop.permute.xlu1 %928 }
 0x1ab   : > { %v970_v25 = vcombine.low %v946_v5, %v962_v14  ;;  %v971_v26 = vcombine.high %v946_v5, %v962_v14  ;;  %v986_v27 = vcombine.low %v953_v6, %v969_v15  ;;  %v987_v28 = vcombine.high %v953_v6, %v969_v15 }
 0x1ac   : > { %v671_v29 = vcombine.low %v647_v18, %v663_v20  ;;  %v672_v30 = vcombine.high %v647_v18, %v663_v20  ;;  %v673_v31 = vcombine.low %v654_v19, %v670_v22  ;;  %v674_v32 = vcombine.high %v654_v19, %v670_v22  ;;  %v682_v59 = vpop.permute.xlu0 %681 }
 0x1ad   : > { %v978_v33 = vrot.slane %v970_v25, %v3288_v42  ;;  %v985_v34 = vrot.slane %v971_v26, %v3288_v42  ;;  %v994_v35 = vrot.slane %v986_v27, %v3288_v42  ;;  %v1001_v37 = vrot.slane %v987_v28, %v3288_v42 }
 0x1ae   : > { %676 = vst.msk [vmem:[#allocation2] sm:$0xff] %vm675_vm3, %v671_v29  ;;  %677 = vst.msk [vmem:[#allocation2 + $0x8] sm:$0xff] %vm675_vm3, %v672_v30  ;;  %v1030_v38 = vrot.slane %v1022_v16, %v3286_v36  ;;  %v1037_v39 = vrot.slane %v1023_v17, %v3286_v36  ;;  %v1006_v40 = vcombine.low %v3278_v24, %v929_v23  ;;  %v685_v43 = vpop.permute.xlu1 %684 }
 0x1af   : > { %678 = vst.msk [vmem:[#allocation2 + $0x10] sm:$0xff] %vm675_vm3, %v673_v31  ;;  %679 = vst.msk [vmem:[#allocation2 + $0x18] sm:$0xff] %vm675_vm3, %v674_v32  ;;  %v1007_v41 = vcombine.high %v3278_v24, %v929_v23  ;;  %v1074_v44 = vcombine.low %v978_v33, %v985_v34  ;;  %v2528_v45 = vcombine.high %v978_v33, %v985_v34 }
 0x1b0   : > { %v1090_v46 = vcombine.low %v994_v35, %v1001_v37  ;;  %v2529_v47 = vcombine.high %v994_v35, %v1001_v37  ;;  %v1014_v48 = vrot.slane %v1006_v40, %v3286_v36  ;;  %v690_v50 = vcombine.low %v3276_v21, %v685_v43 }
 0x1b1   : > { %v1021_v49 = vrot.slane %v1007_v41, %v3286_v36  ;;  %v691_v51 = vcombine.high %v3276_v21, %v685_v43  ;;  %v3327_v52 = vrot.slane %v1074_v44, %v3286_v36  ;;  %v3330_v53 = vrot.slane %v2528_v45, %v3286_v36 }
 0x1b2   : > { %v3333_v24 = vrot.slane %v1090_v46, %v3286_v36  ;;  %v1105_v54 = vrot.slane %v2529_v47, %v3286_v36  ;;  %v1038_v55 = vcombine.low %v1014_v48, %v1030_v38  ;;  %v1039_v56 = vcombine.high %v1014_v48, %v1030_v38  ;;  %v688_v60 = vpop.permute.xlu1 %687 }
 0x1b3   : > { %v1054_v57 = vcombine.low %v1021_v49, %v1037_v39  ;;  %v1055_v58 = vcombine.high %v1021_v49, %v1037_v39  ;;  %v698_v61 = vrot.slane %v690_v50, %v3286_v36  ;;  %v705_v21 = vrot.slane %v691_v51, %v3286_v36 }
 0x1b4   : > { %v706_v62 = vcombine.low %v682_v59, %v688_v60  ;;  %v707_v63 = vcombine.high %v682_v59, %v688_v60  ;;  %v1046_v0 = vrot.slane %v1038_v55, %v3288_v42  ;;  %v1053_v1 = vrot.slane %v1039_v56, %v3288_v42 }
 0x1b5   : > { %v1062_v2 = vrot.slane %v1054_v57, %v3288_v42  ;;  %v1069_v3 = vrot.slane %v1055_v58, %v3288_v42  ;;  %v1210_v6 = vld [vmem:[#allocation2] sm:$0xff]  ;;  %v1106_v8 = vcombine.low %v3327_v52, %v3330_v53  ;;  %v1122_v9 = vcombine.low %v3333_v24, %v1105_v54  ;;  %v1211_v28 = vld [vmem:[#allocation2 + $0x8] sm:$0xff] }
 0x1b6   : > { %v714_v4 = vrot.slane %v706_v62, %v3286_v36  ;;  %v721_v5 = vrot.slane %v707_v63, %v3286_v36  ;;  %v1212_v7 = vld [vmem:[#allocation2 + $0x10] sm:$0xff]  ;;  %v1142_v10 = vcombine.low %v1046_v0, %v1053_v1  ;;  %v2530_v11 = vcombine.high %v1046_v0, %v1053_v1  ;;  %2661 = vmatprep.subr.msk.mxu1 %vm675_vm3, %v1210_v6 }
 0x1b7   : > { %v1158_v12 = vcombine.low %v1062_v2, %v1069_v3  ;;  %v2531_v13 = vcombine.high %v1062_v2, %v1069_v3  ;;  %2671 = vmatprep.subr.msk.mxu0 %vm675_vm3, %v1212_v7  ;;  %2662 = vmatpush3.xpose.msk.msra.mxu1 %vm675_vm3, %v1210_v6  ;;  %v1114_v38 = vrot.slane %v1106_v8, %v3288_v42 }
 0x1b8   : > { %v722_v14 = vcombine.low %v698_v61, %v714_v4  ;;  %v723_v15 = vcombine.high %v698_v61, %v714_v4  ;;  %v738_v16 = vcombine.low %v705_v21, %v721_v5  ;;  %v739_v17 = vcombine.high %v705_v21, %v721_v5  ;;  %2672 = vmatpush3.xpose.msk.msra.mxu0 %vm675_vm3, %v1212_v7  ;;  %v1213_v4 = vld [vmem:[#allocation2 + $0x18] sm:$0xff] }
 0x1b9   : > { %v1149_v18 = vrot.slane %v1142_v10, %v3286_v36  ;;  %v1157_v19 = vrot.slane %v2530_v11, %v3286_v36  ;;  %v1165_v20 = vrot.slane %v1158_v12, %v3286_v36  ;;  %v1173_v22 = vrot.slane %v2531_v13, %v3286_v36  ;;  %2666 = vmatprep.subr.msk.mxu1 %vm675_vm3, %v1211_v28 }
 0x1ba   : > { %v730_v23 = vrot.slane %v722_v14, %v3288_v42  ;;  %v737_v25 = vrot.slane %v723_v15, %v3288_v42  ;;  %v746_v26 = vrot.slane %v738_v16, %v3288_v42  ;;  %v753_v27 = vrot.slane %v739_v17, %v3288_v42 }
 0x1bb   : > { %v1174_v29 = vcombine.low %v1149_v18, %v1157_v19  ;;  %v1175_v30 = vcombine.high %v1149_v18, %v1157_v19  ;;  %v1190_v31 = vcombine.low %v1165_v20, %v1173_v22  ;;  %v1191_v32 = vcombine.high %v1165_v20, %v1173_v22 }
 0x1bc   : > { %v758_v33 = vcombine.low %v730_v23, %v737_v25  ;;  %v2524_v34 = vcombine.high %v730_v23, %v737_v25  ;;  %v774_v35 = vcombine.low %v746_v26, %v753_v27  ;;  %v2525_v37 = vcombine.high %v746_v26, %v753_v27 }
 0x1bd   : > { %v1130_v39 = vrot.slane %v1122_v9, %v3288_v42  ;;  %v1107_v40 = vcombine.high %v3327_v52, %v3330_v53  ;;  %v1123_v41 = vcombine.high %v3333_v24, %v1105_v54  ;;  %v1182_v50 = vrot.slane %v1174_v29, %v3288_v42 }
 0x1be   : > { %v765_v43 = vrot.slane %v758_v33, %v3286_v36  ;;  %v773_v44 = vrot.slane %v2524_v34, %v3286_v36  ;;  %v781_v45 = vrot.slane %v774_v35, %v3286_v36  ;;  %v789_v46 = vrot.slane %v2525_v37, %v3286_v36 }
 0x1bf   : > { %v1138_v47 = vcombine.low %v1114_v38, %v1130_v39  ;;  %v1121_v48 = vrot.slane %v1107_v40, %v3288_v42  ;;  %v1137_v49 = vrot.slane %v1123_v41, %v3288_v42  ;;  %v1198_v54 = vrot.slane %v1190_v31, %v3288_v42 }
 0x1c0   : > { %v790_v51 = vcombine.low %v765_v43, %v773_v44  ;;  %v791_v55 = vcombine.high %v765_v43, %v773_v44  ;;  %v806_v52 = vcombine.low %v781_v45, %v789_v46  ;;  %v807_v53 = vcombine.high %v781_v45, %v789_v46 }
 0x1c1   : > { %2663 = vmatprep.mubr.msk.f32.mxu1 %vm675_vm3, %v1138_v47  ;;  %v1140_v24 = vcombine.low %v1121_v48, %v1137_v49  ;;  %v1189_v56 = vrot.slane %v1175_v30, %v3288_v42  ;;  %v1205_v57 = vrot.slane %v1191_v32, %v3288_v42  ;;  %v1206_v21 = vcombine.low %v1182_v50, %v1198_v54 }
 0x1c2   : > { %v798_v58 = vrot.slane %v790_v51, %v3288_v42  ;;  %v805_v59 = vrot.slane %v791_v55, %v3288_v42  ;;  %v814_v60 = vrot.slane %v806_v52, %v3288_v42  ;;  %v821_v61 = vrot.slane %v807_v53, %v3288_v42 }
 0x1c3   : > { %2673 = vmatprep.mubr.msk.f32.mxu0 %vm675_vm3, %v1140_v24  ;;  %v1208_v62 = vcombine.low %v1189_v56, %v1205_v57  ;;  %v1139_v63 = vcombine.high %v1114_v38, %v1130_v39  ;;  %2664 = vmatmul.mubr.msk.f32.vlgmr.msra.gmra.mxu1 %vm675_vm3, %v1206_v21  ;;  %v1207_v5 = vcombine.high %v1182_v50, %v1198_v54 }
 0x1c4   : > { %v822_v0 = vcombine.low %v798_v58, %v814_v60  ;;  %v823_v1 = vcombine.high %v798_v58, %v814_v60  ;;  %v824_v2 = vcombine.low %v805_v59, %v821_v61  ;;  %v825_v3 = vcombine.high %v805_v59, %v821_v61  ;;  %2667 = vmatpush3.xpose.msk.msra.mxu1 %vm675_vm3, %v1211_v28 }
 0x1c5   : > { %2674 = vmatmul.mubr.msk.f32.vlgmr.msra.gmra.mxu0 %vm675_vm3, %v1208_v62  ;;  %2668 = vmatprep.mubr.msk.f32.mxu1 %vm675_vm3, %v1139_v63  ;;  %v1141_v6 = vcombine.high %v1121_v48, %v1137_v49  ;;  %v1209_v7 = vcombine.high %v1189_v56, %v1205_v57 }
 0x1c6   : > { %826 = vst.msk [vmem:[#allocation3] sm:$0xff] %vm675_vm3, %v822_v0  ;;  %827 = vst.msk [vmem:[#allocation3 + $0x8] sm:$0xff] %vm675_vm3, %v823_v1  ;;  %2676 = vmatprep.subr.msk.mxu1 %vm675_vm3, %v1213_v4 }
 0x1c7   : > { %828 = vst.msk [vmem:[#allocation3 + $0x10] sm:$0xff] %vm675_vm3, %v824_v2  ;;  %829 = vst.msk [vmem:[#allocation3 + $0x18] sm:$0xff] %vm675_vm3, %v825_v3  ;;  %2669 = vmatmul.mubr.msk.f32.vlgmr.msra.gmra.mxu1 %vm675_vm3, %v1207_v5 }
 0x1c8   : > { %2677 = vmatpush3.xpose.msk.msra.mxu1 %vm675_vm3, %v1213_v4  ;;  %2678 = vmatprep.mubr.msk.f32.mxu1 %vm675_vm3, %v1141_v6  ;;  %v2278_v6 = vld [vmem:[%s3554_s5 + $0x38] sm:$0xff] }
 0x1cb   : > { %2679 = vmatmul.mubr.msk.f32.vlgmr.msra.gmra.mxu1 %vm675_vm3, %v1209_v7  ;;  %v2277_v7 = vld [vmem:[%s3554_s5 + $0x30] sm:$0xff] }
 0x1cd   : > { %v1632_v8 = vld [vmem:[#allocation3] sm:$0xff]  ;;  %v1633_v9 = vld [vmem:[#allocation3 + $0x8] sm:$0xff] }
 0x1ce   : > { %2681 = vmatprep.subr.mxu0 %v1632_v8  ;;  %2686 = vmatprep.subr.mxu1 %v1633_v9  ;;  %v3394_v10 = vld [vmem:[#allocation3 + $0x10] sm:$0xff]  ;;  %v3396_v11 = vld [vmem:[#allocation3 + $0x18] sm:$0xff] }
 0x1cf   : > { %2682 = vmatpush3.msra.mxu0 %v1632_v8  ;;  %2687 = vmatpush3.msra.mxu1 %v1633_v9 }
 0x1d0   : > { %2691 = vmatprep.subr.mxu0 %v3394_v10  ;;  %2696 = vmatprep.subr.mxu1 %v3396_v11 }
 0x283   : > { %v2665_v12 = vpop.f32.mrf.mxu1 }
 0x284   : > { %v1555_v14 = vsel %vm1551_vm4, %v2665_v12, -inf }
 0x285   : > { %v2675_v13 = vpop.f32.mrf.mxu0  ;;  %1556 = vmax.xlane.f32.xlu0 %v1555_v14  ;;  %v1290_v15 = vpop.f32.mrf.mxu1 }
 0x286   : > { %v1552_v17 = vsel %vm1551_vm4, %v1290_v15, -inf  ;;  %v1567_v28 = vsel %vm1551_vm4, %v2675_v13, -inf }
 0x287   : > { %v1458_v16 = vpop.f32.mrf.mxu0  ;;  %1553 = vmax.xlane.f32.xlu1 %v1552_v17  ;;  %v2670_v18 = vpop.f32.mrf.mxu1 }
 0x288   : > { %v1564_v19 = vsel %vm1551_vm4, %v1458_v16, -inf  ;;  %v1561_v22 = vsel %vm1551_vm4, %v2670_v18, -inf }
 0x289   : > { %v1374_v20 = vpop.f32.mrf.mxu1  ;;  %1565 = vmax.xlane.f32.xlu0 %v1564_v19 }
 0x28a   : > { %v1558_v25 = vsel %vm1551_vm4, %v1374_v20, -inf }
 0x28b   : > { %1562 = vmax.xlane.f32.xlu1 %v1561_v22  ;;  %v2680_v23 = vpop.f32.mrf.mxu1 }
 0x28c   : > { %v1573_v29 = vsel %vm1551_vm4, %v2680_v23, -inf }
 0x28d   : > { %v1542_v26 = vpop.f32.mrf.mxu1  ;;  %1559 = vmax.xlane.f32.xlu0 %v1558_v25 }
 0x28e   : > { %v1570_v27 = vsel %vm1551_vm4, %v1542_v26, -inf }
 0x28f   : > { %1571 = vmax.xlane.f32.xlu1 %v1570_v27 }
 0x291   : > { %1568 = vmax.xlane.f32.xlu0 %v1567_v28 }
 0x295   : > { %1574 = vmax.xlane.f32.xlu0 %v1573_v29 }
 0x30e   : > { %v1557_v30 = vpop.xlane.xlu0 %1556 }
 0x30f   : > { %v1577_v31 = vsub.f32 %v2665_v12, %v1557_v30 }
 0x310   : > { %v1554_v32 = vpop.xlane.xlu1 %1553 }
 0x311   : > { %v1586_v33 = vmul.f32 1.442695, %v1577_v31  ;;  %v1576_v34 = vsub.f32 %v1290_v15, %v1554_v32 }
 0x312   : > { %v1566_v35 = vpop.xlane.xlu0 %1565 }
 0x313   : > { %2812 = vpow2.f32 %v1586_v33  ;;  %v1584_v37 = vmul.f32 1.442695, %v1576_v34  ;;  %v1580_v38 = vsub.f32 %v1458_v16, %v1566_v35 }
 0x314   : > { %v1563_v39 = vpop.xlane.xlu1 %1562 }
 0x315   : > { %2814 = vpow2.f32 %v1584_v37  ;;  %v1592_v40 = vmul.f32 1.442695, %v1580_v38  ;;  %v1579_v41 = vsub.f32 %v2670_v18, %v1563_v39 }
 0x316   : > { %v1560_v43 = vpop.xlane.xlu0 %1559 }
 0x317   : > { %2816 = vpow2.f32 %v1592_v40  ;;  %v1590_v44 = vmul.f32 1.442695, %v1579_v41  ;;  %v1578_v45 = vsub.f32 %v1374_v20, %v1560_v43 }
 0x318   : > { %v1572_v46 = vpop.xlane.xlu1 %1571 }
 0x319   : > { %2818 = vpow2.f32 %v1590_v44  ;;  %v1588_v47 = vmul.f32 1.442695, %v1578_v45  ;;  %v1582_v48 = vsub.f32 %v1542_v26, %v1572_v46 }
 0x31a   : > { %v1569_v49 = vpop.xlane.xlu0 %1568 }
 0x31b   : > { %2820 = vpow2.f32 %v1588_v47  ;;  %v1596_v50 = vmul.f32 1.442695, %v1582_v48  ;;  %v1581_v51 = vsub.f32 %v2675_v13, %v1569_v49 }
 0x31d   : > { %2822 = vpow2.f32 %v1596_v50  ;;  %v1594_v55 = vmul.f32 1.442695, %v1581_v51 }
 0x31e   : > { %v1575_v52 = vpop.xlane.xlu0 %1574 }
 0x31f   : > { %2824 = vpow2.f32 %v1594_v55  ;;  %v1583_v53 = vsub.f32 %v2680_v23, %v1575_v52 }
 0x320   : > { %v2813_v24 = vpop.eup %2812 }
 0x321   : > { %v1598_v54 = vmul.f32 1.442695, %v1583_v53  ;;  %v1603_v56 = vsel %vm1551_vm4, %v2813_v24, 0.0 }
 0x322   : > { %v2815_v57 = vpop.eup %2814  ;;  %1604 = vadd.xlane.f32.xlu1 %v1603_v56 }
 0x323   : > { %2826 = vpow2.f32 %v1598_v54  ;;  %2683 = vmatprep.mubr.msk.f32.mxu0 %vm1551_vm4, %v2815_v57  ;;  %v1600_v59 = vsel %vm1551_vm4, %v2815_v57, 0.0 }
 0x324   : > { %v2817_v58 = vpop.eup %2816  ;;  %2684 = vmatmul.mubr.msk.f32.vlgmr.msra.gmra.mxu0 %vm1551_vm4, %v2813_v24 }
 0x325   : > { %2692 = vmatpush3.msra.mxu0 %v3394_v10  ;;  %2693 = vmatprep.mubr.msk.f32.mxu0 %vm1551_vm4, %v2817_v58  ;;  %v1612_v62 = vsel %vm1551_vm4, %v2817_v58, 0.0 }
 0x326   : > { %v2819_v60 = vpop.eup %2818  ;;  %1601 = vadd.xlane.f32.xlu1 %v1600_v59  ;;  %2701 = vmatprep.subr.mxu0 %v2278_v6 }
 0x327   : > { %v1609_v61 = vsel %vm1551_vm4, %v2819_v60, 0.0 }
 0x328   : > { %v2821_v21 = vpop.eup %2820  ;;  %1610 = vadd.xlane.f32.xlu0 %v1609_v61 }
 0x329   : > { %2688 = vmatprep.mubr.msk.f32.mxu1 %vm1551_vm4, %v2821_v21  ;;  %v1606_v0 = vsel %vm1551_vm4, %v2821_v21, 0.0 }
 0x32a   : > { %v2823_v63 = vpop.eup %2822  ;;  %1613 = vadd.xlane.f32.xlu1 %v1612_v62  ;;  %2689 = vmatmul.mubr.msk.f32.vlgmr.msra.gmra.mxu1 %vm1551_vm4, %v2819_v60 }
 0x32b   : > { %2697 = vmatpush3.msra.mxu1 %v3396_v11  ;;  %2698 = vmatprep.mubr.msk.f32.mxu1 %vm1551_vm4, %v2823_v63  ;;  %v1618_v3 = vsel %vm1551_vm4, %v2823_v63, 0.0 }
 0x32c   : > { %v2825_v1 = vpop.eup %2824  ;;  %1607 = vadd.xlane.f32.xlu0 %v1606_v0 }
 0x32d   : > { %2694 = vmatmul.mubr.msk.f32.vlgmr.msra.gmra.mxu0 %vm1551_vm4, %v2825_v1  ;;  %v1615_v2 = vsel %vm1551_vm4, %v2825_v1, 0.0 }
 0x32e   : > { %1616 = vadd.xlane.f32.xlu1 %v1615_v2  ;;  %2702 = vmatpush3.msra.mxu0 %v2278_v6  ;;  %v2276_v2 = vld [vmem:[%s3554_s5 + $0x28] sm:$0xff] }
 0x32f   : > { %2703 = vmatprep.subr.mxu0 %v2277_v7 }
 0x330   : > { %v2827_v4 = vpop.eup %2826  ;;  %1619 = vadd.xlane.f32.xlu0 %v1618_v3  ;;  %2704 = vmatpush3.msra.mxu0 %v2277_v7  ;;  %v2275_v3 = vld [vmem:[%s3554_s5 + $0x20] sm:$0xff] }
 0x331   : > { %2699 = vmatmul.mubr.msk.f32.vlgmr.msra.gmra.mxu1 %vm1551_vm4, %v2827_v4  ;;  %v1621_v5 = vsel %vm1551_vm4, %v2827_v4, 0.0  ;;  %2705 = vmatprep.subr.mxu0 %v2276_v2 }
 0x332   : > { %2706 = vmatpush3.msra.mxu0 %v2276_v2 }
 0x333   : > { %2707 = vmatprep.subr.mxu0 %v2275_v3 }
 0x334   : > { %1622 = vadd.xlane.f32.xlu0 %v1621_v5  ;;  %2708 = vmatpush3.msra.mxu0 %v2275_v3 }
 0x3ab   : > { %v1605_v8 = vpop.xlane.xlu1 %1604 }
 0x3ac   : > { %2828 = vrcp.f32 %v1605_v8 }
 0x3af   : > { %v1602_v10 = vpop.xlane.xlu1 %1601 }
 0x3b0   : > { %2830 = vrcp.f32 %v1602_v10 }
 0x3b1   : > { %v1611_v9 = vpop.xlane.xlu0 %1610 }
 0x3b3   : > { %v1614_v12 = vpop.xlane.xlu1 %1613 }
 0x3b5   : > { %v1608_v11 = vpop.xlane.xlu0 %1607 }
 0x3b7   : > { %v1617_v14 = vpop.xlane.xlu1 %1616 }
 0x3b8   : > { %2832 = vrcp.f32 %v1617_v14 }
 0x3b9   : > { %v1620_v13 = vpop.xlane.xlu0 %1619  ;;  %2834 = vrcp.f32 %v1614_v12  ;;  %v2829_v19 = vpop.eup %2828 }
 0x3ba   : > { %2836 = vrcp.f32 %v1611_v9 }
 0x3bb   : > { %2838 = vrcp.f32 %v1608_v11 }
 0x3bd   : > { %v1623_v15 = vpop.xlane.xlu0 %1622  ;;  %v2831_v20 = vpop.eup %2830 }
 0x3be   : > { %2840 = vrcp.f32 %v1623_v15 }
 0x3bf   : > { %2842 = vrcp.f32 %v1620_v13 }
 0x3c5   : > { %v2833_v23 = vpop.eup %2832 }
 0x3c6   : > { %v2835_v25 = vpop.eup %2834 }
 0x3c7   : > { %v2837_v29 = vpop.eup %2836 }
 0x3c8   : > { %v2839_v31 = vpop.eup %2838 }
 0x3cb   : > { %v2841_v34 = vpop.eup %2840 }
 0x3cc   : > { %v2843_v37 = vpop.eup %2842 }
 0x3e4   : > { %v2685_v16 = vpop.f32.mrf.mxu0 }
 0x3e5   : > { %v1961_v32 = vmul.f32 %v2829_v19, %v2685_v16 }
 0x3e6   : > { %v1708_v17 = vpop.f32.mrf.mxu0 }
 0x3e7   : > { %v1960_v35 = vmul.f32 %v2831_v20, %v1708_v17  ;;  %v2274_v20 = vld [vmem:[%s3554_s5 + $0x18] sm:$0xff] }
 0x3e8   : > { %2709 = vmatprep.subr.mxu0 %v2274_v20 }
 0x3e9   : > { %2710 = vmatpush3.msra.mxu0 %v2274_v20 }
 0x3ea   : > { %v2690_v18 = vpop.f32.mrf.mxu1 }
 0x3eb   : > { %v1963_v38 = vmul.f32 %v2837_v29, %v2690_v18 }
 0x3ec   : > { %v1789_v26 = vpop.f32.mrf.mxu1 }
 0x3ed   : > { %v2695_v22 = vpop.f32.mrf.mxu0  ;;  %v1962_v44 = vmul.f32 %v2839_v31, %v1789_v26 }
 0x3ee   : > { %v1965_v27 = vmul.f32 %v2833_v23, %v2695_v22  ;;  %v2273_v22 = vld [vmem:[%s3554_s5 + $0x10] sm:$0xff] }
 0x3ef   : > { %v1870_v28 = vpop.f32.mrf.mxu0  ;;  %2711 = vmatprep.subr.mxu0 %v2273_v22 }
 0x3f0   : > { %v1964_v30 = vmul.f32 %v2835_v25, %v1870_v28  ;;  %v2036_v39 = vcombine.low %v1961_v32, %v1965_v27  ;;  %v2037_v40 = vcombine.high %v1961_v32, %v1965_v27  ;;  %2712 = vmatpush3.msra.mxu0 %v2273_v22 }
 0x3f1   : > { %v2700_v33 = vpop.f32.mrf.mxu1 }
 0x3f2   : > { %v1967_v41 = vmul.f32 %v2841_v34, %v2700_v33  ;;  %v1968_v45 = vcombine.low %v1960_v35, %v1964_v30  ;;  %v1969_v46 = vcombine.high %v1960_v35, %v1964_v30  ;;  %v2044_v55 = vrot.slane %v2036_v39, %v3286_v36 }
 0x3f3   : > { %v1951_v43 = vpop.f32.mrf.mxu1  ;;  %v2051_v52 = vrot.slane %v2037_v40, %v3286_v36 }
 0x3f4   : > { %v1966_v47 = vmul.f32 %v2843_v37, %v1951_v43  ;;  %v2052_v48 = vcombine.low %v1963_v38, %v1967_v41  ;;  %v2053_v49 = vcombine.high %v1963_v38, %v1967_v41  ;;  %v1976_v54 = vrot.slane %v1968_v45, %v3286_v36  ;;  %v2272_v41 = vld [vmem:[%s3554_s5 + $0x8] sm:$0xff] }
 0x3f5   : > { %v1983_v56 = vrot.slane %v1969_v46, %v3286_v36  ;;  %2713 = vmatprep.subr.mxu0 %v2272_v41 }
 0x3f6   : > { %v1984_v50 = vcombine.low %v1962_v44, %v1966_v47  ;;  %v1985_v51 = vcombine.high %v1962_v44, %v1966_v47  ;;  %v2060_v53 = vrot.slane %v2052_v48, %v3286_v36  ;;  %v2067_v24 = vrot.slane %v2053_v49, %v3286_v36  ;;  %2714 = vmatpush3.msra.mxu0 %v2272_v41  ;;  %v2271_v49 = vld [vmem:[%s3554_s5] sm:$0xff] }
 0x3f7   : > { %2715 = vmatprep.subr.mxu0 %v2271_v49 }
 0x3f8   : > { %v1992_v57 = vrot.slane %v1984_v50, %v3286_v36  ;;  %v1999_v58 = vrot.slane %v1985_v51, %v3286_v36  ;;  %v2068_v59 = vcombine.low %v2044_v55, %v2060_v53  ;;  %v2069_v60 = vcombine.high %v2044_v55, %v2060_v53  ;;  %2716 = vmatpush3.msra.mxu0 %v2271_v49 }
 0x3f9   : > { %v2084_v61 = vcombine.low %v2051_v52, %v2067_v24  ;;  %v2085_v21 = vcombine.high %v2051_v52, %v2067_v24 }
 0x3fa   : > { %v2000_v62 = vcombine.low %v1976_v54, %v1992_v57  ;;  %v2001_v63 = vcombine.high %v1976_v54, %v1992_v57  ;;  %v2016_v0 = vcombine.low %v1983_v56, %v1999_v58  ;;  %v2017_v1 = vcombine.high %v1983_v56, %v1999_v58 }
 0x3fb   : > { %v2076_v4 = vrot.slane %v2068_v59, %v3288_v42  ;;  %v2083_v5 = vrot.slane %v2069_v60, %v3288_v42  ;;  %v2092_v6 = vrot.slane %v2084_v61, %v3288_v42  ;;  %v2099_v7 = vrot.slane %v2085_v21, %v3288_v42 }
 0x3fc   : > { %v2008_v8 = vrot.slane %v2000_v62, %v3288_v42  ;;  %v2015_v9 = vrot.slane %v2001_v63, %v3288_v42  ;;  %v2024_v10 = vrot.slane %v2016_v0, %v3288_v42  ;;  %v2031_v11 = vrot.slane %v2017_v1, %v3288_v42 }
 0x3fd   : > { %v2172_v12 = vcombine.low %v2076_v4, %v2083_v5  ;;  %v2554_v13 = vcombine.high %v2076_v4, %v2083_v5  ;;  %v2188_v14 = vcombine.low %v2092_v6, %v2099_v7  ;;  %v2555_v15 = vcombine.high %v2092_v6, %v2099_v7  ;;  %v2556_v4 = vld [vmem:[%s3555_s6] ss:$0 sm:$0xff] }
 0x3fe   : > { %v2104_v16 = vcombine.low %v2008_v8, %v2015_v9  ;;  %v2552_v17 = vcombine.high %v2008_v8, %v2015_v9  ;;  %v2120_v18 = vcombine.low %v2024_v10, %v2031_v11  ;;  %v2553_v19 = vcombine.high %v2024_v10, %v2031_v11 }
 0x3ff   : > { %v2179_v23 = vrot.slane %v2172_v12, %v3286_v36  ;;  %v2187_v25 = vrot.slane %v2554_v13, %v3286_v36  ;;  %v2195_v26 = vrot.slane %v2188_v14, %v3286_v36  ;;  %v2203_v27 = vrot.slane %v2555_v15, %v3286_v36 }
 0x400   : > { %v2111_v28 = vrot.slane %v2104_v16, %v3286_v36  ;;  %v2119_v29 = vrot.slane %v2552_v17, %v3286_v36  ;;  %v2127_v30 = vrot.slane %v2120_v18, %v3286_v36  ;;  %v2135_v31 = vrot.slane %v2553_v19, %v3286_v36 }
 0x401   : > { %v2205_v32 = vcombine.high %v2179_v23, %v2187_v25  ;;  %v2221_v33 = vcombine.high %v2195_v26, %v2203_v27  ;;  %v2204_v34 = vcombine.low %v2179_v23, %v2187_v25  ;;  %v2220_v35 = vcombine.low %v2195_v26, %v2203_v27 }
 0x402   : > { %v2136_v37 = vcombine.low %v2111_v28, %v2119_v29  ;;  %v2152_v38 = vcombine.low %v2127_v30, %v2135_v31  ;;  %v2137_v39 = vcombine.high %v2111_v28, %v2119_v29  ;;  %v2153_v40 = vcombine.high %v2127_v30, %v2135_v31 }
 0x403   : > { %v2219_v43 = vrot.slane %v2205_v32, %v3288_v42  ;;  %v2235_v44 = vrot.slane %v2221_v33, %v3288_v42  ;;  %v2212_v36 = vrot.slane %v2204_v34, %v3288_v42  ;;  %v2228_v45 = vrot.slane %v2220_v35, %v3288_v42 }
 0x404   : > { %v2144_v46 = vrot.slane %v2136_v37, %v3288_v42  ;;  %v2160_v47 = vrot.slane %v2152_v38, %v3288_v42  ;;  %v2151_v48 = vrot.slane %v2137_v39, %v3288_v42  ;;  %v2167_v55 = vrot.slane %v2153_v40, %v3288_v42 }
 0x405   : > { %v2238_v50 = vcombine.low %v2219_v43, %v2235_v44  ;;  %v2237_v51 = vcombine.high %v2212_v36, %v2228_v45  ;;  %v2236_v52 = vcombine.low %v2212_v36, %v2228_v45  ;;  %v2239_v57 = vcombine.high %v2219_v43, %v2235_v44 }
 0x406   : > { %v2168_v53 = vcombine.low %v2144_v46, %v2160_v47  ;;  %v2169_v24 = vcombine.high %v2144_v46, %v2160_v47  ;;  %v2171_v54 = vcombine.high %v2151_v48, %v2167_v55  ;;  %v2170_v56 = vcombine.low %v2151_v48, %v2167_v55 }
 0x407   : > { %2252 = vrot.lane.b32.xlu1 %v2238_v50, %s3028_s12  ;;  %2244 = vrot.lane.b32.xlu0 %v2237_v51, %s3029_s11 }
 0x40b   : > { %2242 = vrot.lane.b32.xlu1 %v2169_v24, %s3029_s11  ;;  %2258 = vrot.lane.b32.xlu0 %v2171_v54, %s3030_s30 }
 0x40f   : > { %2250 = vrot.lane.b32.xlu1 %v2170_v56, %s3028_s12 }
 0x413   : > { %2260 = vrot.lane.b32.xlu1 %v2239_v57, %s3030_s30 }
 0x479   : > { %v2253_v58 = vpop.permute.xlu1 %2252  ;;  %v2245_v42 = vpop.permute.xlu0 %2244 }
 0x47a   : > { %v2265_v21 = vsel %vm675_vm3, %v2236_v52, %v2245_v42 }
 0x47b   : > { %v2267_v2 = vsel %vm836_vm2, %v2265_v21, %v2253_v58 }
 0x47d   : > { %v2243_v59 = vpop.permute.xlu1 %2242  ;;  %v2259_v62 = vpop.permute.xlu0 %2258 }
 0x47e   : > { %v2264_v60 = vsel %vm675_vm3, %v2168_v53, %v2243_v59 }
 0x481   : > { %v2251_v61 = vpop.permute.xlu1 %2250 }
 0x482   : > { %v2266_v63 = vsel %vm836_vm2, %v2264_v60, %v2251_v61 }
 0x483   : > { %v2269_v0 = vsel %vm379_vm1, %v2266_v63, %v2259_v62 }
 0x484   : > { %2717 = vmatprep.mubr.msk.f32.mxu0 %vm2286_vm5, %v2269_v0 }
 0x485   : > { %v2261_v1 = vpop.permute.xlu1 %2260 }
 0x486   : > { %v2270_v3 = vsel %vm379_vm1, %v2267_v2, %v2261_v1 }
 0x487   : > { %2718 = vmatmul.mubr.msk.f32.vlgmr.msra.gmra.mxu0 %vm2286_vm5, %v2270_v3 }
 0x547   : > { %v2719_v5 = vpop.f32.mrf.mxu0 }
 0x548   : > { %v2365_v6 = vadd.f32 %v2719_v5, %v2556_v4 }
 0x549   : > { %v2359_v7 = vpop.f32.mrf.mxu0 }
 0x54a   : > { %2369 = vst.msk [vmem:[%s365_s19 + $0x8] sm:$0xff] %vm836_vm2, %v2365_v6  ;;  %v2360_v8 = vadd.f32 %v2556_v4, %v2359_v7 }
 0x54c   : > { %2368 = vst.msk [vmem:[%s365_s19] sm:$0xff] %vm836_vm2, %v2360_v8 }
 0x54d   : > { %2939 = shalt.err (!%p2936_p6)
}
 0x54e   : > { %s2940_s15 = scalar_lea.hbm %s3499_s24, 256  ;;  %s2944_s8 = scalar_lea.hbm %s3587_s22, 512 }
 0x54f   : > { %p2941_p9 = scmp.ne.s32.totalorder %s3499_s24, %s2940_s15  ;;  %p2945_p11 = scmp.lt.s32.totalorder %s3499_s24, %s3587_s22 }
 0x550   : > { %p2946_p3 = scmp.lt.s32.totalorder %s2944_s8, %s2940_s15 }
 0x551   : > { %p2942_p12 = pnand %p2941_p9, %p3160_p0 }
 0x552   : > { %p2947_p1 = por %p2946_p3, %p2945_p11 }
 0x553   : > { %p2943_p13 = pneg %p2942_p12 }
 0x555   : > { %p2948_p4 = pnand %p2947_p1, %p2943_p13 }
 0x557   : > { %2951 = shalt.err (!%p2948_p4)
}
 0x558   : > { %s3032_s11 = smov 128   ;;  %s3033_s30 = smov 8  }
 0x559   : > { %2728 = dma.vmem_to_hbm [thread:$0]  (%p3160_p0), %s3494_s20, 256, %s3499_s24, %s2371_s2, %s3032_s11, %s3032_s11, %s3033_s30  }
 0x55a PF: > { %s3588_s16 = sld [smem:[#allocation15_spill]] }
 0x55b   : > { %s3589_s7 = sld [smem:[#allocation18_spill]] }
 0x55c   : > { %s3590_s19 = sld [smem:[#allocation17_spill]] }
 0x560   : > { %s2401_s18 = sand.u32 1, %s3588_s16  }
 0x561   : > { %p3591_p8 = scmp.ne.s32.totalorder %s3589_s7, 0  ;;  %s2402_s21 = scalar_lea.sflag [#allocation6], %s2401_s18 }
 0x563   : > { %p2742_p5 = pnand %p2509_p10, %p3591_p8 }
 0x565   : > { %p2743_p7 = pneg %p2742_p5 }
 0x567   : > { %2989 = dma.done.wait (%p2743_p7), %s2402_s21, 256  }
 0x568   : > { %2991 = vsyncadd (%p2743_p7), %s2402_s21, 4294967040  ;;  %s26_s29 = sadd.s32 1, %s3590_s19   ;;  %s3592_s13 = sld [smem:[#allocation16_spill]] }
 0x569   : > { %p23_p2 = scmp.ge.s32.totalorder %s26_s29, 4   ;;  %s3593_s26 = sld [smem:[#allocation20_spill]] }
 0x56a   : > { %s3594_s23 = sld [smem:[#allocation19_spill]]  ;;  %s3595_s24 = smov %s2998_s25 }
 0x56b   : > { %s3597_s27 = smov %s3010_s28 }
 0x56c   :  { %25 = sbr.rel (!%p23_p2) target bundleno = 12 (0xc), region = 114 }
 0x56e   : > { %s3596_s25 = smov %s3592_s13 }
 0x570   : > { %s3598_s28 = smov %s3594_s23 }
 0x571   :  { %2407 = vsyncpa [#allocation5], 1 }
 0x572   :  { %2409 = vsyncpa [#allocation5 + $0x1], 1 }
 0x573   :  { %2410 = vsyncpa [#allocation8], 1 }
 0x574   :  { %2412 = vsyncpa [#allocation8 + $0x1], 1 }
 0x575   :  { %2413 = vsyncpa [#allocation6], 1 }
 0x576   :  { %2415 = vsyncpa [#allocation6 + $0x1], 1 }

</bundles_post_ra>
